<compile_context>
chip_gen: v6e
topology: v6e:2x2x1
jax: 0.10.0
libtpu: 0.0.40
codegen_flags: <defaults>
</compile_context>

<pallas_src>
import functools

import jax
import jax.numpy as jnp
from jax.experimental import pallas as pl
from jax.experimental.pallas import tpu as pltpu

LN_EPS = 1e-5


def _embed_kernel(x_ref, w_ref, p_ref, o_ref):
    """Fused Linear + LayerNorm on a (tm, in_dim) row tile.

    x_ref : (tm, in_dim)      bf16 input rows
    w_ref : (in_dim, embed)   bf16 pre-transposed Linear weight (W.T), resident
    p_ref : (3, embed)        f32 packed [bias; gamma; beta], resident
    o_ref : (tm, embed)       output rows
    """
    # Linear: bf16 MXU matmul with f32 accumulation, then f32 bias add.
    y = jnp.dot(x_ref[...], w_ref[...], preferred_element_type=jnp.float32)
    y = y + p_ref[0:1, :]

    # LayerNorm over the last (embed) axis — biased variance, matching torch.
    inv_d = jnp.float32(1.0 / y.shape[-1])
    mean = jnp.sum(y, axis=-1, keepdims=True) * inv_d
    centered = y - mean
    var = jnp.sum(centered * centered, axis=-1, keepdims=True) * inv_d
    # Fold gamma into the rsqrt scale (rsqrt -> EUP slot, nearly free).
    scale = jax.lax.rsqrt(var + LN_EPS) * p_ref[1:2, :]
    out = centered * scale + p_ref[2:3, :]

    # TODO(synk): training-mode Dropout would use pltpu.prng_seed /
    #             pltpu.prng_random_bits; eval mode is identity.
    o_ref[...] = out.astype(o_ref.dtype)


def _round_up(x, n):
    return ((x + n - 1) // n) * n


@functools.partial(jax.jit, static_argnames=("tm",))
def embedding_model_forward(inputs, w_t, bias, gamma, beta, *, tm=256):
    """inputs: (b, s, in_dim) -> (b, s, embed_dim)."""
    b, s, in_dim = inputs.shape
    embed_dim = w_t.shape[1]
    m = b * s

    # Effective row tile: multiple of 8 (f32 sublane), no larger than needed,
    # and preferring >=2 grid steps so v7x's two TensorCores are both used.
    tm_eff = min(tm, max(8, _round_up((m + 1) // 2, 8)))
    m_pad = _round_up(m, tm_eff)
    grid = m_pad // tm_eff

    x2d = inputs.reshape(m, in_dim)            # _stack_inputs: 'b s e -> (b s) e'
    if m_pad != m:
        x2d = jnp.pad(x2d, ((0, m_pad - m), (0, 0)))

    # bf16 matmul operands (native MXU path, half the HBM traffic).
    x_bf16 = x2d.astype(jnp.bfloat16)
    w_bf16 = w_t.astype(jnp.bfloat16)
    # Pack the small per-feature vectors into one resident f32 block.
    params = jnp.stack([
        bias.astype(jnp.float32),
        gamma.astype(jnp.float32),
        beta.astype(jnp.float32),
    ])  # (3, embed_dim)

    out_itemsize = jnp.dtype(inputs.dtype).itemsize
    cost = pl.CostEstimate(
        flops=2 * m_pad * in_dim * embed_dim,
        transcendentals=0,
        bytes_accessed=(x_bf16.size * 2 + w_bf16.size * 2 + params.size * 4
                        + m_pad * embed_dim * out_itemsize),
    )

    out2d = pl.pallas_call(
        _embed_kernel,
        out_shape=jax.ShapeDtypeStruct((m_pad, embed_dim), inputs.dtype),
        grid_spec=pltpu.PrefetchScalarGridSpec(
            num_scalar_prefetch=0,
            grid=(grid,),
            in_specs=[
                pl.BlockSpec((tm_eff, in_dim), lambda i: (i, 0)),        # x rows
                pl.BlockSpec((in_dim, embed_dim), lambda i: (0, 0)),     # W.T (resident)
                pl.BlockSpec((3, embed_dim), lambda i: (0, 0)),          # bias/gamma/beta
            ],
            out_specs=pl.BlockSpec((tm_eff, embed_dim), lambda i: (i, 0)),
        ),
        compiler_params=pltpu.CompilerParams(
            dimension_semantics=("parallel",),
            vmem_limit_bytes=48 * 1024 * 1024,   # headroom below v7x's 64 MiB
        ),
        cost_estimate=cost,
    )(x_bf16, w_bf16, params)

    if m_pad != m:
        out2d = out2d[:m]
    return out2d.reshape(b, s, embed_dim)      # _unstack_inputs: '(b s) e -> b s e'


def _reference_forward(inputs, w_t, bias, gamma, beta):
    """Pure-JAX reference (Linear + LayerNorm, eval-mode dropout).

    Inputs/weight quantized to bf16 first so the comparison matches the
    kernel's bf16-operand / f32-accumulate matmul.
    """
    b, s, _ = inputs.shape
    x = inputs.reshape(b * s, -1).astype(jnp.bfloat16).astype(jnp.float32)
    w = w_t.astype(jnp.bfloat16).astype(jnp.float32)
    y = x @ w + bias.astype(jnp.float32)
    mean = jnp.mean(y, axis=-1, keepdims=True)
    var = jnp.mean((y - mean) ** 2, axis=-1, keepdims=True)
    y = (y - mean) / jnp.sqrt(var + LN_EPS)
    y = y * gamma.astype(jnp.float32) + beta.astype(jnp.float32)
    return y.reshape(b, s, -1)


if __name__ == "__main__":
    # Small shapes consistent with the module's (b, s, in_dim) -> (b, s, embed_dim)
    # contract. (Module defaults are in_dim=1024, embed_dim=768; scaled down.)
    b, s = 2, 8
    in_dim, embed_dim = 128, 128

    key = jax.random.PRNGKey(0)
    k_x, k_w, k_b = jax.random.split(key, 3)

    inputs = jax.random.normal(k_x, (b, s, in_dim), dtype=jnp.float32)

    # Deterministic parameter init (synthetic; shapes follow torch.nn.Linear /
    # torch.nn.LayerNorm of the module's __init__).
    bound = 1.0 / (in_dim ** 0.5)
    weight = jax.random.uniform(k_w, (embed_dim, in_dim), jnp.float32, -bound, bound)
    bias = jax.random.uniform(k_b, (embed_dim,), jnp.float32, -bound, bound)
    gamma = jnp.ones((embed_dim,), jnp.float32)   # LayerNorm weight init
    beta = jnp.zeros((embed_dim,), jnp.float32)   # LayerNorm bias init

    w_t = weight.T  # pre-transpose so the kernel does x @ W.T as a plain matmul

    out = embedding_model_forward(inputs, w_t, bias, gamma, beta)
    out = jax.block_until_ready(out)

    ref = _reference_forward(inputs, w_t, bias, gamma, beta)
    assert out.shape == (b, s, embed_dim), out.shape
    assert jnp.allclose(out, ref, atol=5e-3, rtol=5e-3), float(
        jnp.max(jnp.abs(out - ref))
    )

    print("KERNEL_OK")
</pallas_src>

<mosaic_0001>
module attributes {stable_mosaic.version = 11 : i64} {
  func.func @_embed_kernel(%arg0: i32, %arg1: memref<8x128xbf16, #tpu.memory_space<vmem>>, %arg2: memref<128x128xbf16, #tpu.memory_space<vmem>>, %arg3: memref<3x128xf32, #tpu.memory_space<vmem>>, %arg4: memref<8x128xf32, #tpu.memory_space<vmem>>) attributes {dimension_semantics = [#tpu.dimension_semantics<parallel>], iteration_bounds = array<i64: 2>, scalar_prefetch = 0 : i64, scratch_operands = 0 : i64, tpu.core_type = #tpu.core_type<tc>, window_params = [{transform_indices = @transform_0, window_bounds = array<i64: 8, 128>}, {pipeline_mode = #tpu.pipeline_mode<synchronous>, transform_indices = @transform_1, window_bounds = array<i64: 128, 128>}, {pipeline_mode = #tpu.pipeline_mode<synchronous>, transform_indices = @transform_2, window_bounds = array<i64: 3, 128>}, {transform_indices = @transform_3, window_bounds = array<i64: 8, 128>}]} {
    %c0 = arith.constant 0 : index
    %c0_0 = arith.constant 0 : index
    %0 = vector.load %arg1[%c0, %c0_0] : memref<8x128xbf16, #tpu.memory_space<vmem>>, vector<8x128xbf16>
    %c0_1 = arith.constant 0 : index
    %c0_2 = arith.constant 0 : index
    %1 = vector.load %arg2[%c0_1, %c0_2] : memref<128x128xbf16, #tpu.memory_space<vmem>>, vector<128x128xbf16>
    %cst = arith.constant dense<0.000000e+00> : vector<8x128xf32>
    %2 = tpu.matmul %0, %1, %cst {dimension_numbers = #tpu.dot_dimension_numbers<[1], [0], [0], [1], [0, 0, 1, 1], [], []>} : vector<8x128xbf16>, vector<128x128xbf16>, vector<8x128xf32> -> vector<8x128xf32>
    %c0_3 = arith.constant 0 : index
    %c0_4 = arith.constant 0 : index
    %3 = vector.load %arg3[%c0_3, %c0_4] : memref<3x128xf32, #tpu.memory_space<vmem>>, vector<1x128xf32>
    %4 = vector.broadcast %3 : vector<1x128xf32> to vector<8x128xf32>
    %5 = arith.addf %2, %4 : vector<8x128xf32>
    %cst_5 = arith.constant dense<0.000000e+00> : vector<8xf32>
    %6 = vector.multi_reduction <add>, %5, %cst_5 [1] : vector<8x128xf32> to vector<8xf32>
    %7 = vector.shape_cast %6 : vector<8xf32> to vector<8x1xf32>
    %cst_6 = arith.constant 7.812500e-03 : f32
    %8 = vector.broadcast %cst_6 : f32 to vector<8x1xf32>
    %9 = arith.mulf %7, %8 : vector<8x1xf32>
    %10 = vector.broadcast %9 : vector<8x1xf32> to vector<8x128xf32>
    %11 = arith.subf %5, %10 : vector<8x128xf32>
    %12 = arith.mulf %11, %11 : vector<8x128xf32>
    %cst_7 = arith.constant dense<0.000000e+00> : vector<8xf32>
    %13 = vector.multi_reduction <add>, %12, %cst_7 [1] : vector<8x128xf32> to vector<8xf32>
    %14 = vector.shape_cast %13 : vector<8xf32> to vector<8x1xf32>
    %cst_8 = arith.constant 7.812500e-03 : f32
    %15 = vector.broadcast %cst_8 : f32 to vector<8x1xf32>
    %16 = arith.mulf %14, %15 : vector<8x1xf32>
    %cst_9 = arith.constant 9.99999974E-6 : f32
    %17 = vector.broadcast %cst_9 : f32 to vector<8x1xf32>
    %18 = arith.addf %16, %17 : vector<8x1xf32>
    %19 = math.rsqrt %18 : vector<8x1xf32>
    %c1 = arith.constant 1 : index
    %c0_10 = arith.constant 0 : index
    %20 = vector.load %arg3[%c1, %c0_10] : memref<3x128xf32, #tpu.memory_space<vmem>>, vector<1x128xf32>
    %21 = vector.broadcast %19 : vector<8x1xf32> to vector<8x128xf32>
    %22 = vector.broadcast %20 : vector<1x128xf32> to vector<8x128xf32>
    %23 = arith.mulf %21, %22 : vector<8x128xf32>
    %24 = arith.mulf %11, %23 : vector<8x128xf32>
    %c2 = arith.constant 2 : index
    %c0_11 = arith.constant 0 : index
    %25 = vector.load %arg3[%c2, %c0_11] : memref<3x128xf32, #tpu.memory_space<vmem>>, vector<1x128xf32>
    %26 = vector.broadcast %25 : vector<1x128xf32> to vector<8x128xf32>
    %27 = arith.addf %24, %26 : vector<8x128xf32>
    %c0_12 = arith.constant 0 : index
    %c0_13 = arith.constant 0 : index
    %28 = vector.load %arg4[%c0_12, %c0_13] : memref<8x128xf32, #tpu.memory_space<vmem>>, vector<8x128xf32>
    tpu.vector_store %arg4[%c0_12, %c0_13], %27 {strides = array<i32>} : memref<8x128xf32, #tpu.memory_space<vmem>>, vector<8x128xf32>,
    return
  }
  func.func @transform_0(%arg0: i32) -> (i32, i32) {
    %c0_i32 = arith.constant 0 : i32
    %c0_i32_0 = arith.constant 0 : i32
    return %arg0, %c0_i32 : i32, i32
  }
  func.func @transform_1(%arg0: i32) -> (i32, i32) {
    %c0_i32 = arith.constant 0 : i32
    %c0_i32_0 = arith.constant 0 : i32
    %c0_i32_1 = arith.constant 0 : i32
    return %c0_i32, %c0_i32_0 : i32, i32
  }
  func.func @transform_2(%arg0: i32) -> (i32, i32) {
    %c0_i32 = arith.constant 0 : i32
    %c0_i32_0 = arith.constant 0 : i32
    %c0_i32_1 = arith.constant 0 : i32
    return %c0_i32, %c0_i32_0 : i32, i32
  }
  func.func @transform_3(%arg0: i32) -> (i32, i32) {
    %c0_i32 = arith.constant 0 : i32
    %c0_i32_0 = arith.constant 0 : i32
    return %arg0, %c0_i32 : i32, i32
  }
}

</mosaic_0001>

<bundles_post_ra>
// kernel: embedding_model_forward.1
= control target key start
LH: loop header
LB: loop body
LE: loop exit
PB: predicated region body
PF: predicated region fallthrough
CT: control target
= control target key end

     0   :  { %8 = vsyncpa [#allocation3], 0  ;;  %s680_s0 = inlined_call_operand.vmem [shape: bf16[16,128], index: 0, kind: input, shape index: {}]   ;;  %s681_s1 = inlined_call_operand.vmem [shape: bf16[128,128], index: 1, kind: input, shape index: {}]   ;;  %s682_s2 = inlined_call_operand.vmem [shape: f32[3,128], index: 2, kind: input, shape index: {}]   ;;  %s683_s3 = inlined_call_operand.hbm [shape: f32[16,128], index: 3, kind: output, shape index: {}]  }
   0x1   :  { %10 = vsyncpa [#allocation3 + $0x1], 0  ;;  %s560_s12 = smov 0   ;;  %s562_s13 = smov 0  }
   0x2   :  { %s564_s14 = smov 0   ;;  %s566_s15 = smov 0  }
   0x3 LB: > { %s581_s16 = sadd.s32 4294967295, %s535_s15   ;;  %s374_s17 = sadd.s32 4294967294, %s535_s15   ;;  %s535_s15 = sphi %s566_s15, %s689_s15   ;;  %s531_s14 = sphi %s564_s14, %s688_s14   ;;  %s527_s13 = sphi %s562_s13, %s687_s13   ;;  %s523_s12 = sphi %s560_s12, %s686_s12  }
   0x4   : > { %s585_s18 = sadd.s32 1, %s535_s15   ;;  %s91_s19 = sadd.s32 1, %s531_s14 }
   0x5   : > { %s88_s20 = ssub.s32 %s535_s15, %s585_s18  ;;  %p101_p0 = scmp.ne.s32.totalorder %s531_s14, %s527_s13 }
   0x6   : > { %p89_p1 = scmp.eq.s32.totalorder %s88_s20, 0  ;;  %p102_p2 = scmp.eq.s32.totalorder %s581_s16, 1 }
   0x7   : > { %p107_p3 = scmp.ne.s32.totalorder %s527_s13, %s523_s12  ;;  %p108_p4 = scmp.eq.s32.totalorder %s374_s17, 1 }
   0x8   : > { %s596_s21 = scalar_select %p89_p1, %s531_s14, %s91_s19  }
   0x9   : > { %p598_p5 = por %p102_p2, %p101_p0  ;;  %p602_p6 = por %p108_p4, %p107_p3 }
   0xa   : > { %p377_p7 = scmp.ge.s32.totalorder %s535_s15, 1  ;;  %p139_p8 = scmp.lt.s32.totalorder %s535_s15, 3 }
   0xc   : > { %p140_p9 = pnand %p377_p7, %p139_p8 }
   0xd   : > { %p162_p10 = scmp.lt.s32.totalorder (!%p140_p9), %s581_s16, 1  ;;  %s159_s29 = sand.u32 (!%p140_p9), 1, %s527_s13  }
   0xe   : > { %143 = sbr.rel (%p140_p9) target bundleno = 566 (0x236), region = 32  ;;  %s378_s30 = sshll.u32 (!%p140_p9), %s159_s29, 3 }
   0xf   : > { %s392_s8 = sshll.u32 (!%p140_p9), %s581_s16, 7  ;;  %s302_s20 = scalar_lea.sflag (!%p140_p9), [#allocation3], %s159_s29 }
  0x10   : > { %s313_s19 = scalar_lea.hbm (!%p140_p9), %s683_s3, %s392_s8  ;;  %s539_s25 = smov (!%p140_p9), [#allocation2]  }
  0x13   : > { %v465_v0 = vld [vmem:[%s681_s1 + $0x38] sm:$0xff]   ;;  %v537_v1 = vmov 0.0   ;;  %v466_v2 = vld [vmem:[%s681_s1 + $0x30] sm:$0xff]   ;;  %vm538_vm0 = vmmov 0   ;;  %v467_v3 = vld [vmem:[%s681_s1 + $0x28] sm:$0xff]   ;;  %s163_s9 = scalar_select %p162_p10, %s581_s16, 1 }
  0x14   : > { %404 = vmatprep.subr.bf16.mxu0 %v537_v1  ;;  %420 = vmatprep.mubr.msk.bf16.mxu0 %vm538_vm0, %v537_v1  ;;  %v468_v4 = vld [vmem:[%s681_s1 + $0x20] sm:$0xff]   ;;  %v469_v5 = vld [vmem:[%s681_s1 + $0x18] sm:$0xff]   ;;  %v470_v6 = vld [vmem:[%s681_s1 + $0x10] sm:$0xff]  }
  0x15   : > { %405 = vmatpush3.bf16.msra.mxu0 %v465_v0  ;;  %v471_v7 = vld [vmem:[%s681_s1 + $0x8] sm:$0xff]   ;;  %s379_s17 = sshll.u32 %s163_s9, 2  ;;  %v472_v8 = vld [vmem:[%s681_s1] sm:$0xff]   ;;  %s161_s9 = scalar_lea.vmem [#allocation2], %s378_s30 }
  0x16   : > { %406 = vmatprep.subr.bf16.mxu0 %v537_v1  ;;  %s165_s26 = scalar_lea.vmem %s680_s0, %s379_s17  ;;  %v380_v10 = vld [vmem:[%s682_s2] ss:$0 sm:$0xff]  ;;  %v389_v23 = vld [vmem:[%s682_s2 + $0x1] ss:$0 sm:$0xff]  ;;  %v390_v26 = vld [vmem:[%s682_s2 + $0x2] ss:$0 sm:$0xff] }
  0x17   : > { %v167_v9 = vld [vmem:[%s165_s26] sm:$0xf]  ;;  %s315_s10 = sshll.u32 %s161_s9, 4  ;;  %s479_s26 = sshll.u32 %s539_s25, 4  ;;  %s316_s10 = int_to_ptr.vmem [resolvable:$true] %s315_s10  ;;  %s480_s26 = int_to_ptr.vmem [resolvable:$false] %s479_s26 }
  0x18   : > { %s475_s24 = scalar_lea.vmem %s316_s10, 128  ;;  %s481_s16 = scalar_lea.vmem %s480_s26, 256 }
  0x19   : > { %407 = vmatpush3.bf16.msra.mxu0 %v466_v2  ;;  %p476_p11 = scmp.ne.s32.totalorder %s316_s10, %s475_s24  ;;  %p482_p0 = scmp.lt.s32.totalorder %s316_s10, %s480_s26 }
  0x1a   : > { %408 = vmatprep.subr.bf16.mxu0 %v537_v1  ;;  %p483_p1 = scmp.lt.s32.totalorder %s481_s16, %s475_s24 }
  0x1b   : > { %p477_p12 = pnand %p476_p11, %p598_p5 }
  0x1c   : > { %p484_p2 = por %p483_p1, %p482_p0 }
  0x1d   : > { %409 = vmatpush3.bf16.msra.mxu0 %v467_v3  ;;  %p478_p13 = pneg %p477_p12 }
  0x1e   : > { %410 = vmatprep.subr.bf16.mxu0 %v537_v1 }
  0x1f   : > { %p485_p3 = pnand %p484_p2, %p478_p13 }
  0x21   : > { %411 = vmatpush3.bf16.msra.mxu0 %v468_v4 }
  0x22   : > { %412 = vmatprep.subr.bf16.mxu0 %v537_v1 }
  0x25   : > { %413 = vmatpush3.bf16.msra.mxu0 %v469_v5 }
  0x26   : > { %414 = vmatprep.subr.bf16.mxu0 %v537_v1 }
  0x29   : > { %415 = vmatpush3.bf16.msra.mxu0 %v470_v6 }
  0x2a   : > { %416 = vmatprep.subr.bf16.mxu0 %v537_v1 }
  0x2d   : > { %417 = vmatpush3.bf16.msra.mxu0 %v471_v7 }
  0x2e   : > { %418 = vmatprep.subr.bf16.mxu0 %v537_v1 }
  0x31   : > { %419 = vmatpush3.bf16.msra.mxu0 %v472_v8 }
  0x34   : > { %421 = vmatmul.mubr.bf16.vlgmr.msra.gmra.mxu0 %v167_v9 }
  0xf4   : > { %v271_v11 = vpop.f32.mrf.mxu0 }
  0xf5   : > { %v272_v12 = vadd.f32 %v380_v10, %v271_v11 }
  0xf6   : > { %v422_v13 = vpop.f32.mrf.mxu0 }
  0xf7   : > { %277 = vadd.xlane.f32.xlu0 %v272_v12 }
  0xf8   : > { %v274_v14 = vpop.f32.mrf.mxu0 }
  0xfa   : > { %v423_v15 = vpop.f32.mrf.mxu0 }
 0x180   : > { %v278_v16 = vpop.xlane.xlu0 %277 }
 0x181   : > { %v279_v17 = vmul.f32 0.0078125, %v278_v16 }
 0x183   : > { %v280_v18 = vsub.f32 %v272_v12, %v279_v17 }
 0x185   : > { %v281_v19 = vmul.f32 %v280_v18, %v280_v18 }
 0x187   : > { %282 = vadd.xlane.f32.xlu0 %v281_v19 }
 0x210   : > { %v283_v20 = vpop.xlane.xlu0 %282 }
 0x211   : > { %v284_v21 = vmul.f32 0.0078125, %v283_v20 }
 0x213   : > { %v285_v22 = vadd.f32 1e-05, %v284_v21 }
 0x215   : > { %473 = vrsqrt.f32 %v285_v22 }
 0x222   : > { %v474_v24 = vpop.eup %473 }
 0x223   : > { %v292_v25 = vmul.f32 %v474_v24, %v389_v23 }
 0x225   : > { %v293_v27 = vmul.f32 %v292_v25, %v280_v18 }
 0x227   : > { %v299_v28 = vadd.f32 %v390_v26, %v293_v27 }
 0x229   : > { %300 = vst [vmem:[%s161_s9] sm:$0xff] %v299_v28 }
 0x22a   : > { %488 = shalt.err (!%p485_p3)
}
 0x22b   : > { %s489_s27 = scalar_lea.hbm %s313_s19, 128  ;;  %s493_s30 = scalar_lea.hbm %s683_s3, 256 }
 0x22c   : > { %p490_p4 = scmp.ne.s32.totalorder %s313_s19, %s489_s27  ;;  %p494_p9 = scmp.lt.s32.totalorder %s313_s19, %s683_s3 }
 0x22d   : > { %p495_p10 = scmp.lt.s32.totalorder %s493_s30, %s489_s27 }
 0x22e   : > { %p491_p7 = pnand %p490_p4, %p598_p5 }
 0x22f   : > { %p496_p11 = por %p495_p10, %p494_p9 }
 0x230   : > { %p492_p8 = pneg %p491_p7 }
 0x232   : > { %p497_p12 = pnand %p496_p11, %p492_p8 }
 0x234   : > { %500 = shalt.err (!%p497_p12)
}
 0x235   : > { %424 = dma.vmem_to_hbm [thread:$0]  (%p598_p5), %s316_s10, 128, %s313_s19, %s302_s20  }
 0x236 PF: > { %p430_p13 = scmp.ge.s32.totalorder %s535_s15, 2  ;;  %s327_s6 = sand.u32 1, %s523_s12  }
 0x237   : > { %s328_s7 = scalar_lea.sflag [#allocation3], %s327_s6 }
 0x238   : > { %p427_p0 = pnand %p430_p13, %p602_p6 }
 0x23a   : > { %p428_p1 = pneg %p427_p0 }
 0x23c   : > { %518 = dma.done.wait (%p428_p1), %s328_s7, 128  }
 0x23d   : > { %520 = vsyncadd (%p428_p1), %s328_s7, 4294967168  ;;  %p13_p2 = scmp.ge.s32.totalorder %s585_s18, 4   ;;  %s686_s12 = smov %s527_s13 }
 0x23e   : > { %s687_s13 = smov %s531_s14  ;;  %s688_s14 = smov %s596_s21 }
 0x23f   : > { %s689_s15 = smov %s585_s18  ;;  %15 = sbr.rel (!%p13_p2) target bundleno = 3 (0x3), region = 67 }
 0x244   :  { %333 = vsyncpa [#allocation3], 1 }
 0x245   :  { %335 = vsyncpa [#allocation3 + $0x1], 1 }

</bundles_post_ra>
